<compile_context>
chip_gen: v7x
topology: tpu7x:2x2x1
jax: 0.10.0
libtpu: 0.0.40
codegen_flags: <defaults>
</compile_context>

<pallas_src>
import jax
import jax.numpy as jnp
from jax.experimental import pallas as pl
from jax.experimental.pallas import tpu as pltpu

EPS = 1e-5          # PyTorch BatchNorm1d default eps
B = 2
L = 9               # 128 * 9 == 1152, required by x.view(B, 1152)
C1, C2, C3 = 32, 64, 128


def _bn_relu(y, gamma, beta, inv_n):
    """Training-mode BatchNorm1d + ReLU, single reduction pass.

    Biased variance via E[y^2] - E[y]^2 (matches PyTorch's normalization);
    scale/shift precomputed so per-element work is one FMA + max.
    NOTE: E[y^2]-E[y]^2 can cancel catastrophically for huge activations;
    with O(1) activations here it is numerically benign.
    """
    s1 = jnp.sum(y, axis=0, keepdims=True) * inv_n            # E[y]    (1, C)
    s2 = jnp.sum(y * y, axis=0, keepdims=True) * inv_n        # E[y^2]  (1, C)
    var = s2 - s1 * s1
    scale = gamma * jax.lax.rsqrt(var + EPS)                   # (1, C)
    shift = beta - s1 * scale                                  # (1, C)
    return jnp.maximum(y * scale + shift, 0.0)


def feature_kernel(x_ref, p1_ref, w2_ref, p2_ref, w3_ref, p3_ref, o_ref):
    n = x_ref.shape[0]
    inv_n = 1.0 / n

    x = x_ref[...]                                   # (N, 1), N = B*L

    # ---- layer 1: conv1(1->32, k=1) + bn1 + relu, fully fused -------------
    sx = jnp.sum(x, axis=0, keepdims=True) * inv_n             # (1,1) E[x]
    sx2 = jnp.sum(x * x, axis=0, keepdims=True) * inv_n        # (1,1) E[x^2]
    vx = sx2 - sx * sx                                         # (1,1) Var[x]

    p1 = p1_ref[...]                                 # (3, C1): [w1; gamma1; beta1]
    w1, g1, be1 = p1[0:1, :], p1[1:2, :], p1[2:3, :]
    a1 = w1 * g1 * jax.lax.rsqrt(vx * (w1 * w1) + EPS)         # (1, C1)
    c1 = be1 - sx * a1                                         # (1, C1)
    h1 = jnp.maximum(x * a1 + c1, 0.0)               # (N, C1): one FMA + relu

    # ---- layer 2: conv2(32->64, k=1) == channel matmul, bn2 + relu --------
    p2 = p2_ref[...]                                 # (2, C2): [gamma2; beta2]
    y2 = jnp.dot(h1, w2_ref[...], preferred_element_type=jnp.float32)
    h2 = _bn_relu(y2, p2[0:1, :], p2[1:2, :], inv_n)

    # ---- layer 3: conv3(64->128, k=1) == channel matmul, bn3 + relu -------
    p3 = p3_ref[...]                                 # (2, C3): [gamma3; beta3]
    y3 = jnp.dot(h2, w3_ref[...], preferred_element_type=jnp.float32)
    o_ref[...] = _bn_relu(y3, p3[0:1, :], p3[1:2, :], inv_n)


def init_params(key):
    """Packed parameters (PyTorch layout noted per entry).

    Conv biases are intentionally absent: under training-mode BN the bias is
    removed exactly by the mean subtraction, so the forward output is
    unaffected (only the unused running_mean buffers would differ).
    """
    k1, k2, k3 = jax.random.split(key, 3)
    scale = 0.1
    w1 = jax.random.normal(k1, (1, C1), jnp.float32) * scale   # conv1.weight (32,1,1)  -> (1,32)
    w2 = jax.random.normal(k2, (C1, C2), jnp.float32) * scale  # conv2.weight (64,32,1) -> (32,64)
    w3 = jax.random.normal(k3, (C2, C3), jnp.float32) * scale  # conv3.weight (128,64,1)-> (64,128)
    ones = lambda c: jnp.ones((1, c), jnp.float32)             # bnN.weight default
    zeros = lambda c: jnp.zeros((1, c), jnp.float32)           # bnN.bias default
    return dict(
        p1=jnp.concatenate([w1, ones(C1), zeros(C1)], axis=0),   # (3, 32)
        w2=w2,
        p2=jnp.concatenate([ones(C2), zeros(C2)], axis=0),       # (2, 64)
        w3=w3,
        p3=jnp.concatenate([ones(C3), zeros(C3)], axis=0),       # (2, 128)
    )


def feature_forward(x_ncl, params):
    """x_ncl: (B, 1, L) float32 (PyTorch NCL layout). Returns (B, 128*L)."""
    b, cin, l = x_ncl.shape
    assert cin == 1 and C3 * l == 1152, (cin, l)
    n = b * l
    # (B, 1, L) -> (B*L, 1): pure reshape (middle dim is 1), no transpose HLO.
    x_rows = x_ncl.reshape(n, 1)

    vmem = pl.BlockSpec(memory_space=pltpu.MemorySpace.VMEM)
    out_rows = pl.pallas_call(
        feature_kernel,
        out_shape=jax.ShapeDtypeStruct((n, C3), jnp.float32),
        in_specs=[vmem] * 6,
        out_specs=vmem,
    )(x_rows, params["p1"], params["w2"], params["p2"],
      params["w3"], params["p3"])

    # PyTorch x.view(B, 1152) is channel-major per batch: out[b, c*L + l].
    # (B*L, C) -> (B, L, C) -> (B, C, L) -> (B, C*L): layout glue only.
    # The trailing F.relu is dropped: h3 >= 0 already (exact no-op).
    return out_rows.reshape(b, l, C3).transpose(0, 2, 1).reshape(b, C3 * l)


def feature_reference(x_ncl, params):
    """Plain-JAX reference mirroring the PyTorch forward (training-mode BN)."""
    b, _, l = x_ncl.shape
    x = x_ncl.reshape(b * l, 1)
    p1, p2, p3 = params["p1"], params["p2"], params["p3"]

    def bn_relu(y, g, be):
        m = jnp.mean(y, axis=0, keepdims=True)
        v = jnp.mean((y - m) ** 2, axis=0, keepdims=True)
        return jnp.maximum((y - m) * jax.lax.rsqrt(v + EPS) * g + be, 0.0)

    h1 = bn_relu(x * p1[0:1, :], p1[1:2, :], p1[2:3, :])
    h2 = bn_relu(h1 @ params["w2"], p2[0:1, :], p2[1:2, :])
    h3 = bn_relu(h2 @ params["w3"], p3[0:1, :], p3[1:2, :])
    out = h3.reshape(b, l, C3).transpose(0, 2, 1).reshape(b, C3 * l)
    return jnp.maximum(out, 0.0)


if __name__ == "__main__":
    key = jax.random.PRNGKey(0)
    k_x, k_p = jax.random.split(key)
    x = jax.random.normal(k_x, (B, 1, L), jnp.float32)
    params = init_params(k_p)

    fwd = jax.jit(feature_forward)
    out = jax.block_until_ready(fwd(x, params))

    assert out.shape == (B, 1152), out.shape
    assert bool(jnp.all(jnp.isfinite(out)))

    ref = feature_reference(x, params)
    assert bool(jnp.allclose(out, ref, rtol=1e-4, atol=1e-4)), \
        float(jnp.max(jnp.abs(out - ref)))

    # TODO(synk): fc1/fc2/bn1_fc/bn2_fc exist in __init__ but are unused by
    # forward (the fc path is a dead string literal), so they are not implemented.
    print("KERNEL_OK")
</pallas_src>

<mosaic_0001>
module attributes {stable_mosaic.version = 11 : i64} {
  func.func @feature_kernel(%arg0: memref<18x1xf32, #tpu.memory_space<vmem>>, %arg1: memref<3x32xf32, #tpu.memory_space<vmem>>, %arg2: memref<32x64xf32, #tpu.memory_space<vmem>>, %arg3: memref<2x64xf32, #tpu.memory_space<vmem>>, %arg4: memref<64x128xf32, #tpu.memory_space<vmem>>, %arg5: memref<2x128xf32, #tpu.memory_space<vmem>>, %arg6: memref<18x128xf32, #tpu.memory_space<vmem>>) attributes {dimension_semantics = [], scalar_prefetch = 0 : i64, scratch_operands = 0 : i64, tpu.core_type = #tpu.core_type<tc>} {
    %c0 = arith.constant 0 : index
    %c0_0 = arith.constant 0 : index
    %0 = vector.load %arg0[%c0, %c0_0] : memref<18x1xf32, #tpu.memory_space<vmem>>, vector<18x1xf32>
    %cst = arith.constant dense<0.000000e+00> : vector<1xf32>
    %1 = vector.multi_reduction <add>, %0, %cst [0] : vector<18x1xf32> to vector<1xf32>
    %2 = vector.shape_cast %1 : vector<1xf32> to vector<1x1xf32>
    %cst_1 = arith.constant 0.055555556 : f32
    %3 = vector.broadcast %cst_1 : f32 to vector<1x1xf32>
    %4 = arith.mulf %2, %3 : vector<1x1xf32>
    %5 = arith.mulf %0, %0 : vector<18x1xf32>
    %cst_2 = arith.constant dense<0.000000e+00> : vector<1xf32>
    %6 = vector.multi_reduction <add>, %5, %cst_2 [0] : vector<18x1xf32> to vector<1xf32>
    %7 = vector.shape_cast %6 : vector<1xf32> to vector<1x1xf32>
    %cst_3 = arith.constant 0.055555556 : f32
    %8 = vector.broadcast %cst_3 : f32 to vector<1x1xf32>
    %9 = arith.mulf %7, %8 : vector<1x1xf32>
    %10 = arith.mulf %4, %4 : vector<1x1xf32>
    %11 = arith.subf %9, %10 : vector<1x1xf32>
    %c0_4 = arith.constant 0 : index
    %c0_5 = arith.constant 0 : index
    %12 = vector.load %arg1[%c0_4, %c0_5] : memref<3x32xf32, #tpu.memory_space<vmem>>, vector<3x32xf32>
    %13 = vector.extract_strided_slice %12 {offsets = [0, 0], sizes = [1, 32], strides = [1, 1]} : vector<3x32xf32> to vector<1x32xf32>
    %14 = vector.extract_strided_slice %12 {offsets = [1, 0], sizes = [1, 32], strides = [1, 1]} : vector<3x32xf32> to vector<1x32xf32>
    %15 = vector.extract_strided_slice %12 {offsets = [2, 0], sizes = [1, 32], strides = [1, 1]} : vector<3x32xf32> to vector<1x32xf32>
    %16 = arith.mulf %13, %14 : vector<1x32xf32>
    %17 = arith.mulf %13, %13 : vector<1x32xf32>
    %18 = vector.broadcast %11 : vector<1x1xf32> to vector<1x32xf32>
    %19 = arith.mulf %18, %17 : vector<1x32xf32>
    %cst_6 = arith.constant 9.99999974E-6 : f32
    %20 = vector.broadcast %cst_6 : f32 to vector<1x32xf32>
    %21 = arith.addf %19, %20 : vector<1x32xf32>
    %22 = math.rsqrt %21 : vector<1x32xf32>
    %23 = arith.mulf %16, %22 : vector<1x32xf32>
    %24 = vector.broadcast %4 : vector<1x1xf32> to vector<1x32xf32>
    %25 = arith.mulf %24, %23 : vector<1x32xf32>
    %26 = arith.subf %15, %25 : vector<1x32xf32>
    %27 = vector.broadcast %0 : vector<18x1xf32> to vector<18x32xf32>
    %28 = vector.broadcast %23 : vector<1x32xf32> to vector<18x32xf32>
    %29 = arith.mulf %27, %28 : vector<18x32xf32>
    %30 = vector.broadcast %26 : vector<1x32xf32> to vector<18x32xf32>
    %31 = arith.addf %29, %30 : vector<18x32xf32>
    %cst_7 = arith.constant 0.000000e+00 : f32
    %32 = vector.broadcast %cst_7 : f32 to vector<18x32xf32>
    %33 = arith.maximumf %31, %32 : vector<18x32xf32>
    %c0_8 = arith.constant 0 : index
    %c0_9 = arith.constant 0 : index
    %34 = vector.load %arg3[%c0_8, %c0_9] : memref<2x64xf32, #tpu.memory_space<vmem>>, vector<2x64xf32>
    %c0_10 = arith.constant 0 : index
    %c0_11 = arith.constant 0 : index
    %35 = vector.load %arg2[%c0_10, %c0_11] : memref<32x64xf32, #tpu.memory_space<vmem>>, vector<32x64xf32>
    %cst_12 = arith.constant dense<0.000000e+00> : vector<18x64xf32>
    %36 = tpu.matmul %33, %35, %cst_12 {dimension_numbers = #tpu.dot_dimension_numbers<[1], [0], [0], [1], [0, 0, 1, 1], [], []>} : vector<18x32xf32>, vector<32x64xf32>, vector<18x64xf32> -> vector<18x64xf32>
    %37 = vector.extract_strided_slice %34 {offsets = [0, 0], sizes = [1, 64], strides = [1, 1]} : vector<2x64xf32> to vector<1x64xf32>
    %38 = vector.extract_strided_slice %34 {offsets = [1, 0], sizes = [1, 64], strides = [1, 1]} : vector<2x64xf32> to vector<1x64xf32>
    %cst_13 = arith.constant dense<0.000000e+00> : vector<64xf32>
    %39 = vector.multi_reduction <add>, %36, %cst_13 [0] : vector<18x64xf32> to vector<64xf32>
    %40 = vector.shape_cast %39 : vector<64xf32> to vector<1x64xf32>
    %cst_14 = arith.constant 0.055555556 : f32
    %41 = vector.broadcast %cst_14 : f32 to vector<1x64xf32>
    %42 = arith.mulf %40, %41 : vector<1x64xf32>
    %43 = arith.mulf %36, %36 : vector<18x64xf32>
    %cst_15 = arith.constant dense<0.000000e+00> : vector<64xf32>
    %44 = vector.multi_reduction <add>, %43, %cst_15 [0] : vector<18x64xf32> to vector<64xf32>
    %45 = vector.shape_cast %44 : vector<64xf32> to vector<1x64xf32>
    %cst_16 = arith.constant 0.055555556 : f32
    %46 = vector.broadcast %cst_16 : f32 to vector<1x64xf32>
    %47 = arith.mulf %45, %46 : vector<1x64xf32>
    %48 = arith.mulf %42, %42 : vector<1x64xf32>
    %49 = arith.subf %47, %48 : vector<1x64xf32>
    %cst_17 = arith.constant 9.99999974E-6 : f32
    %50 = vector.broadcast %cst_17 : f32 to vector<1x64xf32>
    %51 = arith.addf %49, %50 : vector<1x64xf32>
    %52 = math.rsqrt %51 : vector<1x64xf32>
    %53 = arith.mulf %37, %52 : vector<1x64xf32>
    %54 = arith.mulf %42, %53 : vector<1x64xf32>
    %55 = arith.subf %38, %54 : vector<1x64xf32>
    %56 = vector.broadcast %53 : vector<1x64xf32> to vector<18x64xf32>
    %57 = arith.mulf %36, %56 : vector<18x64xf32>
    %58 = vector.broadcast %55 : vector<1x64xf32> to vector<18x64xf32>
    %59 = arith.addf %57, %58 : vector<18x64xf32>
    %cst_18 = arith.constant 0.000000e+00 : f32
    %60 = vector.broadcast %cst_18 : f32 to vector<18x64xf32>
    %61 = arith.maximumf %59, %60 : vector<18x64xf32>
    %c0_19 = arith.constant 0 : index
    %c0_20 = arith.constant 0 : index
    %62 = vector.load %arg5[%c0_19, %c0_20] : memref<2x128xf32, #tpu.memory_space<vmem>>, vector<2x128xf32>
    %c0_21 = arith.constant 0 : index
    %c0_22 = arith.constant 0 : index
    %63 = vector.load %arg4[%c0_21, %c0_22] : memref<64x128xf32, #tpu.memory_space<vmem>>, vector<64x128xf32>
    %cst_23 = arith.constant dense<0.000000e+00> : vector<18x128xf32>
    %64 = tpu.matmul %61, %63, %cst_23 {dimension_numbers = #tpu.dot_dimension_numbers<[1], [0], [0], [1], [0, 0, 1, 1], [], []>} : vector<18x64xf32>, vector<64x128xf32>, vector<18x128xf32> -> vector<18x128xf32>
    %65 = vector.extract_strided_slice %62 {offsets = [0, 0], sizes = [1, 128], strides = [1, 1]} : vector<2x128xf32> to vector<1x128xf32>
    %66 = vector.extract_strided_slice %62 {offsets = [1, 0], sizes = [1, 128], strides = [1, 1]} : vector<2x128xf32> to vector<1x128xf32>
    %cst_24 = arith.constant dense<0.000000e+00> : vector<128xf32>
    %67 = vector.multi_reduction <add>, %64, %cst_24 [0] : vector<18x128xf32> to vector<128xf32>
    %68 = vector.shape_cast %67 : vector<128xf32> to vector<1x128xf32>
    %cst_25 = arith.constant 0.055555556 : f32
    %69 = vector.broadcast %cst_25 : f32 to vector<1x128xf32>
    %70 = arith.mulf %68, %69 : vector<1x128xf32>
    %71 = arith.mulf %64, %64 : vector<18x128xf32>
    %cst_26 = arith.constant dense<0.000000e+00> : vector<128xf32>
    %72 = vector.multi_reduction <add>, %71, %cst_26 [0] : vector<18x128xf32> to vector<128xf32>
    %73 = vector.shape_cast %72 : vector<128xf32> to vector<1x128xf32>
    %cst_27 = arith.constant 0.055555556 : f32
    %74 = vector.broadcast %cst_27 : f32 to vector<1x128xf32>
    %75 = arith.mulf %73, %74 : vector<1x128xf32>
    %76 = arith.mulf %70, %70 : vector<1x128xf32>
    %77 = arith.subf %75, %76 : vector<1x128xf32>
    %cst_28 = arith.constant 9.99999974E-6 : f32
    %78 = vector.broadcast %cst_28 : f32 to vector<1x128xf32>
    %79 = arith.addf %77, %78 : vector<1x128xf32>
    %80 = math.rsqrt %79 : vector<1x128xf32>
    %81 = arith.mulf %65, %80 : vector<1x128xf32>
    %82 = arith.mulf %70, %81 : vector<1x128xf32>
    %83 = arith.subf %66, %82 : vector<1x128xf32>
    %84 = vector.broadcast %81 : vector<1x128xf32> to vector<18x128xf32>
    %85 = arith.mulf %64, %84 : vector<18x128xf32>
    %86 = vector.broadcast %83 : vector<1x128xf32> to vector<18x128xf32>
    %87 = arith.addf %85, %86 : vector<18x128xf32>
    %cst_29 = arith.constant 0.000000e+00 : f32
    %88 = vector.broadcast %cst_29 : f32 to vector<18x128xf32>
    %89 = arith.maximumf %87, %88 : vector<18x128xf32>
    %c0_30 = arith.constant 0 : index
    %c0_31 = arith.constant 0 : index
    %90 = vector.load %arg6[%c0_30, %c0_31] : memref<18x128xf32, #tpu.memory_space<vmem>>, vector<18x128xf32>
    tpu.vector_store %arg6[%c0_30, %c0_31], %89 {strides = array<i32>} : memref<18x128xf32, #tpu.memory_space<vmem>>, vector<18x128xf32>,
    return
  }
}

</mosaic_0001>

<bundles_post_ra>
// kernel: feature_forward.1
= control target key start
LH: loop header
LB: loop body
LE: loop exit
PB: predicated region body
PF: predicated region fallthrough
CT: control target
= control target key end

     0   :  { %11 = vsyncpa [#allocation3], 0  ;;  %s559_s21 = smov [#allocation2]   ;;  %s687_s0 = inlined_call_operand.vmem [shape: f32[18,1], index: 0, kind: input, shape index: {}]   ;;  %s688_s1 = inlined_call_operand.vmem [shape: f32[3,32], index: 1, kind: input, shape index: {}]   ;;  %s689_s2 = inlined_call_operand.vmem [shape: f32[32,64], index: 2, kind: input, shape index: {}]   ;;  %s690_s3 = inlined_call_operand.vmem [shape: f32[2,64], index: 3, kind: input, shape index: {}]   ;;  %s691_s4 = inlined_call_operand.hbm [shape: f32[64,128], index: 4, kind: input, shape index: {}]   ;;  %s692_s5 = inlined_call_operand.vmem [shape: f32[2,128], index: 5, kind: input, shape index: {}]   ;;  %s693_s6 = inlined_call_operand.vmem [shape: f32[18,128], index: 6, kind: output, shape index: {}]  }
   0x1   :  { %s25_s22 = sshll.u32 %s559_s21, 4  ;;  %s535_s25 = scalar_lea.hbm %s691_s4, 1024  ;;  %s26_s22 = int_to_ptr.vmem [resolvable:$true] %s25_s22 }
   0x2   :  { %p536_p0 = scmp.ne.s32.totalorder %s691_s4, %s535_s25  ;;  %p539_p1 = scmp.lt.u32.totalorder %s535_s25, %s691_s4 }
   0x4   :  { %p541_p2 = pnand %p539_p1, %p536_p0 }
   0x6   :  { %544 = shalt.err (!%p541_p2)
}
   0x7   :  { %s545_s30 = scalar_lea.vmem %s26_s22, 1024  ;;  %p550_p4 = scmp.lt.s32.totalorder %s26_s22, %s26_s22 }
   0x8   :  { %p546_p3 = scmp.ne.s32.totalorder %s26_s22, %s545_s30  ;;  %p551_p5 = scmp.lt.s32.totalorder %s545_s30, %s545_s30 }
   0xa   :  { %p552_p6 = por %p551_p5, %p550_p4 }
   0xc   :  { %p553_p7 = pnand %p552_p6, %p546_p3 }
   0xe   :  { %556 = shalt.err (!%p553_p7)
}
   0xf   :  { %s560_s7 = smov 128   ;;  %s561_s8 = smov 8  }
  0x10   :  { %31 = dma.hbm_to_vmem [thread:$0]  %s691_s4, 1024, %s26_s22, [#allocation3], %s560_s7, %s560_s7, %s561_s8  }
  0x11   :  { %557 = dma.done.wait [#allocation3], 1024  }
  0x12   :  { %558 = vsyncadd [#allocation3], 4294966272  ;;  %v562_v0 = vmov 0   ;;  %vm40_vm0 = vcmask 7168   ;;  %vm44_vm1 = vcmask 1024   ;;  %v37_v1 = vld [vmem:[%s687_s0] sm:$0xff]  ;;  %v111_v47 = vlaneseq }
  0x13   :  { %527 = vset.pattern.permute.xlu0 %v562_v0  ;;  %528 = vset.pattern.permute.xlu1 %v562_v0  ;;  %v38_v2 = vld [vmem:[%s687_s0 + $0x8] sm:$0xff]  ;;  %v39_v3 = vld [vmem:[%s687_s0 + $0x10] sm:$0x3]  ;;  %v41_v4 = vsel %vm40_vm0, %v37_v1, 0.0  ;;  %v54_v7 = vmul.f32 %v37_v1, %v37_v1  ;;  %v129_v33 = vld [vmem:[%s689_s2] sm:$0xff]  ;;  %v563_v36 = vmov 0.0|0.0  }
  0x14   :  { %v42_v5 = vsel %vm40_vm0, %v38_v2, 0.0  ;;  %v45_v6 = vsel %vm44_vm1, %v39_v3, 0.0  ;;  %98 = vperm.xlu1 %528, %v37_v1   ;;  %v55_v9 = vmul.f32 %v38_v2, %v38_v2  ;;  %v56_v10 = vmul.f32 %v39_v3, %v39_v3  ;;  %v130_v34 = vld [vmem:[%s689_s2 + $0x8] sm:$0xff]  ;;  %502 = vmatprep.subr.bf16.mxu0 %v563_v36  ;;  %v131_v37 = vld [vmem:[%s689_s2 + $0x10] sm:$0xff]  ;;  %v132_v38 = vld [vmem:[%s689_s2 + $0x18] sm:$0xff] }
  0x15   :  { %v43_v8 = vadd.f32 %v42_v5, %v41_v4  ;;  %v57_v11 = vsel %vm40_vm0, %v54_v7, 0.0  ;;  %v503_v35 = vpack.c.bf16 %v130_v34, %v129_v33  ;;  %508 = vmatprep.subr.bf16.mxu1 %v563_v36  ;;  %v506_v39 = vpack.c.bf16 %v132_v38, %v131_v37  ;;  %v71_v41 = vld [vmem:[%s688_s1] sm:$0x7] }
  0x16   :  { %v58_v13 = vsel %vm40_vm0, %v55_v9, 0.0  ;;  %v60_v14 = vsel %vm44_vm1, %v56_v10, 0.0  ;;  %vm564_vm2 = vmmov 0   ;;  %v565_v40 = vmov 0.0   ;;  %v281_v9 = vld [vmem:[#allocation2 + $0x8] sm:$0xff] }
  0x17   :  { %v46_v12 = vadd.f32 %v45_v6, %v43_v8  ;;  %v59_v15 = vadd.f32 %v58_v13, %v57_v11  ;;  %504 = vmatpush3.bf16.msra.mxu0 %v503_v35  ;;  %468 = vmatprep.mubr.msk.f32.mxu0 %vm564_vm2, %v565_v40  ;;  %v76_v42 = vmul.f32 %v71_v41, %v71_v41  ;;  %v73_v46 = vrot.slane %v71_v41, 1  ;;  %v280_v8 = vld [vmem:[#allocation2] sm:$0xff]  ;;  %v282_v11 = vld [vmem:[#allocation2 + $0x10] sm:$0xff] }
  0x18   :  { %103 = vperm.xlu1 %528, %v38_v2   ;;  %505 = vmatprep.subr.bf16.mxu0 %v563_v36  ;;  %v644_v49 = vshrl.u32 %v111_v47, 7  ;;  %vm133_vm3 = vcmask 261120   ;;  %v509_v10 = vpack.c.bf16 %v281_v9, %v280_v8  ;;  %vm223_vm4 = vcmask 523264  }
  0x19   :  { %v47_v16 = vrot.slane %v46_v12, 4  ;;  %v61_v17 = vadd.f32 %v60_v14, %v59_v15  ;;  %493 = vmatprep.mubr.msk.f32.mxu1 %vm564_vm2, %v565_v40  ;;  %v75_v48 = vmul.f32 %v73_v46, %v71_v41  ;;  %v284_v14 = vld [vmem:[#allocation2 + $0x20] sm:$0xff]  ;;  %v285_v15 = vld [vmem:[#allocation2 + $0x28] sm:$0xff]  ;;  %vm227_vm5 = vcmask 517120  }
  0x1a   :  { %v647_v52 = vsub.s32 0, %v644_v49  ;;  %v120_v57 = vsub.s32 2, %v644_v49  ;;  %510 = vmatpush3.bf16.msra.mxu1 %v509_v10  ;;  %vm378_vm6 = vcmask 1041408  }
  0x1b   :  { %v48_v18 = vadd.f32 %v47_v16, %v46_v12  ;;  %v62_v19 = vrot.slane %v61_v17, 4  ;;  %507 = vmatpush3.bf16.msra.mxu0 %v506_v39  ;;  %511 = vmatprep.subr.bf16.mxu1 %v563_v36  ;;  %v283_v12 = vld [vmem:[#allocation2 + $0x18] sm:$0xff]  ;;  %v515_v16 = vpack.c.bf16 %v285_v15, %v284_v14 }
  0x1c   :  { %v512_v13 = vpack.c.bf16 %v283_v12, %v282_v11 }
  0x1d   :  { %v49_v20 = vrot.slane %v48_v18, 2  ;;  %v63_v21 = vadd.f32 %v62_v19, %v61_v17  ;;  %v286_v17 = vld [vmem:[#allocation2 + $0x30] sm:$0xff] }
  0x1e   :  { %513 = vmatpush3.bf16.msra.mxu1 %v512_v13 }
  0x1f   :  { %v50_v22 = vadd.f32 %v49_v20, %v48_v18  ;;  %v64_v23 = vrot.slane %v63_v21, 2  ;;  %514 = vmatprep.subr.bf16.mxu1 %v563_v36  ;;  %v287_v18 = vld [vmem:[#allocation2 + $0x38] sm:$0xff] }
  0x20   :  { %v518_v19 = vpack.c.bf16 %v287_v18, %v286_v17 }
  0x21   :  { %v51_v24 = vrot.slane %v50_v22, 1  ;;  %v65_v25 = vadd.f32 %v64_v23, %v63_v21 }
  0x22   :  { %516 = vmatpush3.bf16.msra.mxu1 %v515_v16 }
  0x23   :  { %v52_v26 = vadd.f32 %v51_v24, %v50_v22  ;;  %v66_v27 = vrot.slane %v65_v25, 1  ;;  %517 = vmatprep.subr.bf16.mxu1 %v563_v36 }
  0x25   :  { %v53_v28 = vmul.f32 0.055555556, %v52_v26  ;;  %v67_v29 = vadd.f32 %v66_v27, %v65_v25 }
  0x26   :  { %519 = vmatpush3.bf16.msra.mxu1 %v518_v19 }
  0x27   :  { %v69_v30 = vmul.f32 %v53_v28, %v53_v28  ;;  %v68_v31 = vmul.f32 0.055555556, %v67_v29 }
  0x29   :  { %v70_v32 = vsub.f32 %v68_v31, %v69_v30 }
  0x2b   :  { %79 = vperm.xlu0 %527, %v70_v32  }
  0x2f   :  { %88 = vperm.xlu0 %527, %v53_v28  }
  0x33   :  { %108 = vperm.xlu0 %527, %v39_v3  }
  0x93   :  { %v99_v54 = vpop.permute.xlu1 %98 }
  0x97   :  { %v104_v60 = vpop.permute.xlu1 %103 }
  0xaa   :  { %v80_v43 = vpop.permute.xlu0 %79 }
  0xab   :  { %v82_v44 = vmul.f32 %v80_v43, %v76_v42 }
  0xad   :  { %v83_v45 = vadd.f32 1e-05, %v82_v44 }
  0xae   :  { %v89_v53 = vpop.permute.xlu0 %88 }
  0xaf   :  { %529 = vrsqrt.f32 %v83_v45 }
  0xb2   :  { %v109_v3 = vpop.permute.xlu0 %108 }
  0xb9   :  { %v530_v50 = vpop.eup %529 }
  0xba   :  { %v85_v51 = vmul.f32 %v530_v50, %v75_v48 }
  0xbc   :  { %v91_v55 = vmul.f32 %v89_v53, %v85_v51  ;;  %v114_v56 = vrot.slane %v85_v51, %v647_v52 }
  0xbe   :  { %v93_v58 = vrot.slane %v91_v55, 6  ;;  %v115_v62 = vmul.f32 %v114_v56, %v99_v54  ;;  %v116_v0 = vmul.f32 %v114_v56, %v104_v60  ;;  %v117_v4 = vmul.f32 %v114_v56, %v109_v3 }
  0xc0   :  { %v95_v59 = vsub.f32 %v71_v41, %v93_v58 }
  0xc2   :  { %v121_v61 = vrot.slane %v95_v59, %v120_v57  ;;  %v128_v59 = vld [vmem:[%s690_s3] sm:$0x3] }
  0xc4   :  { %v122_v63 = vadd.f32 %v121_v61, %v115_v62  ;;  %v123_v2 = vadd.f32 %v121_v61, %v116_v0  ;;  %v124_v5 = vadd.f32 %v121_v61, %v117_v4  ;;  %v271_v0 = vsub.s32 1, %v644_v49 }
  0xc6   :  { %v125_v1 = vmax.f32 %v122_v63, 0.0  ;;  %v126_v6 = vmax.f32 %v123_v2, 0.0  ;;  %v127_v7 = vmax.f32 %v124_v5, 0.0 }
  0xc8   :  { %469 = vmatmul.mubr.msk.f32.vlgmr.msra.gmra.mrb[0].mxu0 %vm133_vm3, %v125_v1 }
  0xc9   :  { %471 = vmatprep.mubr.msk.f32.mxu0 %vm564_vm2, %v565_v40 }
  0xcc   :  { %472 = vmatmul.mubr.msk.f32.gmra.mrb[2].mxu0 %vm133_vm3, %v126_v6 }
  0xcd   :  { %474 = vmatprep.mubr.msk.f32.mxu0 %vm564_vm2, %v565_v40 }
  0xd0   :  { %475 = vmatmul.mubr.msk.f32.gmra.mrb[4].mxu0 %vm133_vm3, %v127_v7 }
 0x19b   :  { %v209_v20 = vpop.f32.mrb[0].mxu0 }
 0x19c   :  { %v470_v21 = vpop.f32.mrb[1].mxu0  ;;  %v237_v22 = vmul.f32 %v209_v20, %v209_v20  ;;  %v224_v24 = vsel %vm223_vm4, %v209_v20, 0.0 }
 0x19e   :  { %v240_v29 = vsel %vm223_vm4, %v237_v22, 0.0 }
 0x19f   :  { %v214_v23 = vpop.f32.mrb[2].mxu0 }
 0x1a0   :  { %v225_v25 = vsel %vm223_vm4, %v214_v23, 0.0  ;;  %v238_v26 = vmul.f32 %v214_v23, %v214_v23  ;;  %v473_v27 = vpop.f32.mrb[3].mxu0 }
 0x1a1   :  { %v226_v28 = vadd.f32 %v225_v25, %v224_v24 }
 0x1a2   :  { %v241_v30 = vsel %vm223_vm4, %v238_v26, 0.0 }
 0x1a3   :  { %v242_v31 = vadd.f32 %v241_v30, %v240_v29  ;;  %v219_v32 = vpop.f32.mrb[4].mxu0 }
 0x1a4   :  { %v228_v33 = vsel %vm227_vm5, %v219_v32, 0.0  ;;  %v239_v34 = vmul.f32 %v219_v32, %v219_v32  ;;  %v476_v35 = vpop.f32.mrb[5].mxu0 }
 0x1a5   :  { %v229_v36 = vadd.f32 %v228_v33, %v226_v28 }
 0x1a6   :  { %v243_v37 = vsel %vm227_vm5, %v239_v34, 0.0 }
 0x1a7   :  { %v230_v38 = vrot.slane %v229_v36, 4  ;;  %v244_v39 = vadd.f32 %v243_v37, %v242_v31 }
 0x1a9   :  { %v231_v41 = vadd.f32 %v230_v38, %v229_v36  ;;  %v245_v42 = vrot.slane %v244_v39, 4 }
 0x1ab   :  { %v232_v43 = vrot.slane %v231_v41, 2  ;;  %v246_v44 = vadd.f32 %v245_v42, %v244_v39 }
 0x1ad   :  { %v233_v45 = vadd.f32 %v232_v43, %v231_v41  ;;  %v247_v46 = vrot.slane %v246_v44, 2 }
 0x1af   :  { %v234_v47 = vrot.slane %v233_v45, 1  ;;  %v248_v48 = vadd.f32 %v247_v46, %v246_v44  ;;  %v279_v44 = vld [vmem:[%s692_s5] sm:$0x3] }
 0x1b1   :  { %v235_v50 = vadd.f32 %v234_v47, %v233_v45  ;;  %v249_v51 = vrot.slane %v248_v48, 1 }
 0x1b3   :  { %v236_v53 = vmul.f32 0.055555556, %v235_v50  ;;  %v250_v54 = vadd.f32 %v249_v51, %v248_v48 }
 0x1b5   :  { %v251_v55 = vmul.f32 0.055555556, %v250_v54  ;;  %v252_v56 = vmul.f32 %v236_v53, %v236_v53 }
 0x1b7   :  { %v253_v57 = vsub.f32 %v251_v55, %v252_v56 }
 0x1b9   :  { %v254_v58 = vadd.f32 1e-05, %v253_v57 }
 0x1bb   :  { %531 = vrsqrt.f32 %v254_v58 }
 0x1c5   :  { %v532_v60 = vpop.eup %531 }
 0x1c6   :  { %v256_v61 = vmul.f32 %v532_v60, %v128_v59 }
 0x1c8   :  { %v257_v62 = vmul.f32 %v256_v61, %v236_v53  ;;  %v265_v63 = vrot.slane %v256_v61, %v647_v52 }
 0x1ca   :  { %v259_v1 = vrot.slane %v257_v62, 7  ;;  %v268_v2 = vmul.f32 %v265_v63, %v219_v32  ;;  %v266_v3 = vmul.f32 %v265_v63, %v209_v20  ;;  %v267_v4 = vmul.f32 %v265_v63, %v214_v23 }
 0x1cc   :  { %v261_v5 = vsub.f32 %v128_v59, %v259_v1 }
 0x1ce   :  { %v272_v6 = vrot.slane %v261_v5, %v271_v0 }
 0x1d0   :  { %v275_v7 = vadd.f32 %v272_v6, %v268_v2  ;;  %v273_v8 = vadd.f32 %v272_v6, %v266_v3  ;;  %v274_v9 = vadd.f32 %v272_v6, %v267_v4 }
 0x1d2   :  { %v276_v10 = vmax.f32 %v273_v8, 0.0  ;;  %v277_v11 = vmax.f32 %v274_v9, 0.0  ;;  %v278_v49 = vmax.f32 %v275_v7, 0.0 }
 0x1d4   :  { %494 = vmatmul.mubr.msk.f32.vlgmr.msra.gmra.mrb[0].mxu1 %vm223_vm4, %v276_v10 }
 0x1d5   :  { %496 = vmatprep.mubr.msk.f32.mxu1 %vm564_vm2, %v565_v40 }
 0x1d8   :  { %497 = vmatmul.mubr.msk.f32.gmra.mrb[2].mxu1 %vm223_vm4, %v277_v11 }
 0x1d9   :  { %499 = vmatprep.mubr.msk.f32.mxu1 %vm564_vm2, %v565_v40 }
 0x1dc   :  { %500 = vmatmul.mubr.msk.f32.gmra.mrb[4].mxu1 %vm223_vm4, %v278_v49 }
 0x2a7   :  { %v363_v12 = vpop.f32.mrb[0].mxu1 }
 0x2a8   :  { %v495_v13 = vpop.f32.mrb[1].mxu1  ;;  %v388_v15 = vmul.f32 %v363_v12, %v363_v12 }
 0x2ab   :  { %v368_v14 = vpop.f32.mrb[2].mxu1 }
 0x2ac   :  { %v377_v16 = vadd.f32 %v368_v14, %v363_v12  ;;  %v389_v17 = vmul.f32 %v368_v14, %v368_v14  ;;  %v498_v18 = vpop.f32.mrb[3].mxu1 }
 0x2ae   :  { %v391_v19 = vadd.f32 %v389_v17, %v388_v15 }
 0x2af   :  { %v373_v20 = vpop.f32.mrb[4].mxu1 }
 0x2b0   :  { %v379_v21 = vsel %vm378_vm6, %v373_v20, 0.0  ;;  %v390_v22 = vmul.f32 %v373_v20, %v373_v20  ;;  %v501_v23 = vpop.f32.mrb[5].mxu1 }
 0x2b1   :  { %v380_v24 = vadd.f32 %v379_v21, %v377_v16 }
 0x2b2   :  { %v392_v25 = vsel %vm378_vm6, %v390_v22, 0.0 }
 0x2b3   :  { %v381_v26 = vrot.slane %v380_v24, 4  ;;  %v393_v40 = vadd.f32 %v392_v25, %v391_v19 }
 0x2b5   :  { %v382_v27 = vadd.f32 %v381_v26, %v380_v24  ;;  %v394_v28 = vrot.slane %v393_v40, 4 }
 0x2b7   :  { %v383_v29 = vrot.slane %v382_v27, 2  ;;  %v395_v30 = vadd.f32 %v394_v28, %v393_v40 }
 0x2b9   :  { %v384_v31 = vadd.f32 %v383_v29, %v382_v27  ;;  %v396_v32 = vrot.slane %v395_v30, 2 }
 0x2bb   :  { %v385_v33 = vrot.slane %v384_v31, 1  ;;  %v397_v34 = vadd.f32 %v396_v32, %v395_v30 }
 0x2bd   :  { %v386_v35 = vadd.f32 %v385_v33, %v384_v31  ;;  %v398_v36 = vrot.slane %v397_v34, 1 }
 0x2bf   :  { %v387_v37 = vmul.f32 0.055555556, %v386_v35  ;;  %v399_v38 = vadd.f32 %v398_v36, %v397_v34 }
 0x2c1   :  { %v400_v39 = vmul.f32 0.055555556, %v399_v38  ;;  %v401_v41 = vmul.f32 %v387_v37, %v387_v37 }
 0x2c3   :  { %v402_v42 = vsub.f32 %v400_v39, %v401_v41 }
 0x2c5   :  { %v403_v43 = vadd.f32 1e-05, %v402_v42 }
 0x2c7   :  { %533 = vrsqrt.f32 %v403_v43 }
 0x2d1   :  { %v534_v45 = vpop.eup %533 }
 0x2d2   :  { %v405_v46 = vmul.f32 %v534_v45, %v279_v44 }
 0x2d4   :  { %v406_v47 = vmul.f32 %v405_v46, %v387_v37  ;;  %v414_v48 = vrot.slane %v405_v46, %v647_v52 }
 0x2d6   :  { %v408_v50 = vrot.slane %v406_v47, 7  ;;  %v415_v51 = vmul.f32 %v414_v48, %v363_v12  ;;  %v416_v53 = vmul.f32 %v414_v48, %v368_v14  ;;  %v417_v54 = vmul.f32 %v414_v48, %v373_v20 }
 0x2d8   :  { %v410_v55 = vsub.f32 %v279_v44, %v408_v50 }
 0x2da   :  { %v421_v56 = vrot.slane %v410_v55, %v271_v0 }
 0x2dc   :  { %v422_v57 = vadd.f32 %v421_v56, %v415_v51  ;;  %v423_v58 = vadd.f32 %v421_v56, %v416_v53  ;;  %v424_v59 = vadd.f32 %v421_v56, %v417_v54 }
 0x2de   :  { %v425_v60 = vmax.f32 %v422_v57, 0.0  ;;  %v426_v61 = vmax.f32 %v423_v58, 0.0  ;;  %v427_v62 = vmax.f32 %v424_v59, 0.0 }
 0x2e0   :  { %428 = vst [vmem:[%s693_s6] sm:$0xff] %v425_v60  ;;  %429 = vst [vmem:[%s693_s6 + $0x8] sm:$0xff] %v426_v61 }
 0x2e1   :  { %430 = vst [vmem:[%s693_s6 + $0x10] sm:$0x3] %v427_v62 }
 0x2e2   :  { %435 = vsyncpa [#allocation3], 1 }

</bundles_post_ra>
